<compile_context>
chip_gen: v6e
topology: v6e:2x2x1
jax: 0.10.0
libtpu: 0.0.40
codegen_flags: <defaults>
</compile_context>

<pallas_src>
import functools
import math

import jax
import jax.numpy as jnp
import numpy as np
from jax.experimental import pallas as pl
from jax.experimental.pallas import tpu as pltpu

EPS = 1e-07
K1 = 4096.0
MIN_PROB = 0.001
_POS_LANES = 8   # positive-term path only needs columns 0..3; keep 8 for layout


def _nce_kernel(z_ref, x_ref, out_ref, *, nLem, batch, noise_log_bf16):
    x = x_ref[...].astype(jnp.float32)            # (TB, NP) block, NP = full width
    TB, NP = x.shape
    Z = z_ref[0, 0]

    Pnt = 1.0 / float(nLem)                       # Pns == Pnt in the reference
    c_pos0 = K1 * Pnt + EPS                       # denom add for index 0
    c_posk = (K1 / 64.0) * Pnt + EPS              # denom add for index >= 1
    c_noise = K1 * Pnt                            # Pon fill value
    ln_c_noise = math.log(c_noise)                # compile-time constant

    tile = pl.program_id(0)
    row_base = tile * TB

    def _log(v):
        if noise_log_bf16:
            # v6e/v7x only: bf16 packs 2x per vreg on the EUP; accumulate in f32.
            return jnp.log(v.astype(jnp.bfloat16)).astype(jnp.float32)
        return jnp.log(v)

    # ---- per-row group cutoff j in {1,2,3,4} and row validity (narrow) ----
    xs = x[:, :_POS_LANES]                        # (TB, 8)
    # First index in {1,2,3} with x < MIN_PROB, else 4 (matches the
    # `for j in range(1, 5): ... break` loop exactly).
    j = jnp.where(xs[:, 1:2] < MIN_PROB, 1,
        jnp.where(xs[:, 2:3] < MIN_PROB, 2,
        jnp.where(xs[:, 3:4] < MIN_PROB, 3, 4))).astype(jnp.int32)   # (TB, 1)

    row_local = jax.lax.broadcasted_iota(jnp.int32, (TB, 1), 0)
    row_valid = (row_base + row_local) < batch                       # (TB, 1)
    is_global_row0 = (row_local == 0) & (tile == 0)                  # (TB, 1)

    # ---- positive ("data") terms: narrow 8-lane path ----------------------
    col8 = jax.lax.broadcasted_iota(jnp.int32, (TB, _POS_LANES), 1)
    x0 = xs[:, 0:1]                                                   # (TB, 1)

    term0 = jnp.log(x0 / (x0 + c_pos0))                               # (TB, 1)
    Z_temp = Z - x0 * Z + xs                                          # (TB, 8)
    Pmt = xs * (Z * pl.reciprocal(Z_temp, approx=True))
    termk = jnp.log(Pmt / (Pmt + c_posk))                             # (TB, 8)
    terms = jnp.where(col8 == 0, term0, termk)
    pos_mask = (col8 < j) & row_valid
    terms = jnp.where(pos_mask, terms, 0.0)

    # The reference re-adds the running partial sum at every index (i > 0),
    # i.e. per-term weight (j - index); the global first row gets weight 1.
    wt = jnp.where(is_global_row0, 1.0, (j - col8).astype(jnp.float32))
    ln_pmt = jnp.sum(terms * wt)

    # ---- noise terms -------------------------------------------------------
    # sum_{c >= j} log(x + c_noise + eps)
    #   = (full-row log sum) - (narrow 8-lane head over columns < j)
    ln_den_row = jnp.sum(_log(x + (c_noise + EPS)), axis=1, keepdims=True)   # (TB, 1)
    head = jnp.sum(jnp.where(col8 < j, _log(xs + (c_noise + EPS)), 0.0),
                   axis=1, keepdims=True)                                    # (TB, 1)
    noise_logsum = jnp.where(row_valid, ln_den_row - head, 0.0)
    noise_count = jnp.where(row_valid, (NP - j).astype(jnp.float32), 0.0)
    ln_pon = ln_c_noise * jnp.sum(noise_count) - jnp.sum(noise_logsum)

    out_ref[...] = jnp.broadcast_to(ln_pmt + ln_pon, out_ref.shape)


def nce_criterion(x, targets, Z, nLem, tile_b=None, noise_log_bf16=False):
    """Pallas implementation of NCECriterion(nLem).forward(x, targets, Z)."""
    del targets  # unused by the reference forward
    B, n_valid = x.shape
    if n_valid < 5:
        raise ValueError("NCECriterion expects at least 5 scores per sample.")

    # Block-size policy: cap the pipelined input block at ~6 MiB of f32 (double
    # buffers + kernel temporaries stay well under the explicit 40 MiB scoped
    # VMEM limit on every generation), and keep >= 2 tiles when possible so the
    # "parallel" grid axis can feed both v7x TensorCores.
    cap_rows = max(8, ((6 << 20) // (n_valid * 4)) // 8 * 8)
    half_rows = max(8, (((B + 1) // 2) + 7) // 8 * 8)
    if tile_b is None:
        tile_b = min(cap_rows, half_rows)
    else:
        tile_b = min(max(8, (int(tile_b) // 8) * 8), cap_rows)
    if tile_b >= B:
        tile_b = B                      # single full-dim block (8-row rule exempt)
        num_tiles = 1
    else:
        num_tiles = pl.cdiv(B, tile_b)  # trailing partial block masked in-kernel

    z_arr = jnp.array([[Z]], dtype=jnp.float32)
    itemsize = jnp.dtype(x.dtype).itemsize
    cost = pl.CostEstimate(
        flops=int(10 * B * n_valid),
        transcendentals=int(B * (n_valid + 16)),
        bytes_accessed=int(B * n_valid * itemsize + num_tiles * 8 * 128 * 4),
    )

    kernel = functools.partial(_nce_kernel, nLem=nLem, batch=B,
                               noise_log_bf16=noise_log_bf16)
    partials = pl.pallas_call(
        kernel,
        out_shape=jax.ShapeDtypeStruct((num_tiles, 8, 128), jnp.float32),
        grid=(num_tiles,),
        in_specs=[
            pl.BlockSpec(memory_space=pltpu.MemorySpace.SMEM),      # Z scalar
            pl.BlockSpec((tile_b, n_valid), lambda i: (i, 0)),      # x tile (no pad)
        ],
        out_specs=pl.BlockSpec((1, 8, 128), lambda i: (i, 0, 0)),
        compiler_params=pltpu.CompilerParams(
            dimension_semantics=("parallel",),
            vmem_limit_bytes=40 << 20),
        cost_estimate=cost,
    )(z_arr, x)
    return -jnp.sum(partials[:, 0, 0]) / B


def _reference(x, Z, nLem):
    """Plain-Python mirror of the PyTorch loops (float64)."""
    B, N = x.shape
    K = N - 1
    Pnt = 1.0 / nLem
    Pns = 1.0 / nLem
    lnPmtsum = 0.0
    lnPonsum = 0.0
    for i in range(B):
        for j in range(1, 5):
            if x[i][j] < 0.001:
                break
        lnPmt = 0.0
        for index in range(0, j):
            if index == 0:
                Pmt = x[i][0]
                lnPmt = math.log(Pmt / (Pmt + 4096 * Pnt + EPS))
            else:
                Pmt = x[i][index]
                Z_temp = Z - x[i][0] * Z + Pmt
                Pmt = Pmt * (Z / Z_temp)
                lnPmt = lnPmt + math.log(Pmt / (Pmt + 4096 / 64 * Pnt + EPS))
            if i == 0:
                lnPmtsum = lnPmt
            else:
                lnPmtsum = lnPmtsum + lnPmt
        pon = 0.0
        for c in range(j, K + 1):
            pon += math.log((4096 * Pns) / (x[i][c] + 4096 * Pns + EPS))
        if i == 0:
            lnPonsum = pon
        else:
            lnPonsum = lnPonsum + pon
    return -(lnPmtsum + lnPonsum) / B


if __name__ == "__main__":
    key = jax.random.PRNGKey(0)
    B, N = 20, 200          # K = N - 1 = 199 scores per sample
    nLem = 4096             # module constructor arg (compile-time constant)

    kx, kt = jax.random.split(key)
    x = jax.random.uniform(kx, (B, N), dtype=jnp.float32, minval=0.0005, maxval=1.0)
    # Make the data-dependent group size j differ per row (and across tiles).
    x = x.at[0, 0:5].set(jnp.array([0.6, 0.5, 0.4, 0.3, 0.2], dtype=jnp.float32))     # j = 4
    x = x.at[1, 0:5].set(jnp.array([0.7, 0.5, 0.0004, 0.3, 0.2], dtype=jnp.float32))  # j = 2
    x = x.at[5, 0:5].set(jnp.array([0.9, 0.0004, 0.3, 0.3, 0.2], dtype=jnp.float32))  # j = 1
    x = x.at[13, 0:5].set(jnp.array([0.4, 0.3, 0.3, 0.0002, 0.2], dtype=jnp.float32)) # j = 3
    targets = jax.random.randint(kt, (B,), 0, nLem)   # unused by the forward
    Z = 123.456

    ref = _reference(np.asarray(x, dtype=np.float64), float(Z), nLem)

    # tile_b=8 forces 3 tiles (8 + 8 + 4) with a masked partial trailing block.
    loss_small = jax.block_until_ready(nce_criterion(x, targets, Z, nLem, tile_b=8))
    assert abs(float(loss_small) - ref) / max(1.0, abs(ref)) < 1e-3, (float(loss_small), ref)

    # Auto tiling path (>= 2 tiles so both v7x TensorCores get work).
    loss_auto = jax.block_until_ready(nce_criterion(x, targets, Z, nLem))
    assert abs(float(loss_auto) - ref) / max(1.0, abs(ref)) < 1e-3, (float(loss_auto), ref)

    print("KERNEL_OK")
</pallas_src>

<mosaic_0001>
module attributes {stable_mosaic.version = 11 : i64} {
  func.func @_nce_kernel(%arg0: i32, %arg1: memref<1x1xf32, #tpu.memory_space<smem>>, %arg2: memref<8x200xf32, #tpu.memory_space<vmem>>, %arg3: memref<1x8x128xf32, #tpu.memory_space<vmem>>) attributes {dimension_semantics = [#tpu.dimension_semantics<parallel>], iteration_bounds = array<i64: 3>, scalar_prefetch = 0 : i64, scratch_operands = 0 : i64, tpu.core_type = #tpu.core_type<tc>, window_params = [{transform_indices = @transform_0, window_bounds = array<i64: 1, 1>}, {transform_indices = @transform_1, window_bounds = array<i64: 8, 200>}, {transform_indices = @transform_2, window_bounds = array<i64: 1, 8, 128>}]} {
    %c0 = arith.constant 0 : index
    %c0_0 = arith.constant 0 : index
    %0 = vector.load %arg2[%c0, %c0_0] : memref<8x200xf32, #tpu.memory_space<vmem>>, vector<8x200xf32>
    %c0_1 = arith.constant 0 : index
    %c0_2 = arith.constant 0 : index
    %1 = memref.load %arg1[%c0_1, %c0_2] : memref<1x1xf32, #tpu.memory_space<smem>>
    %c8_i32 = arith.constant 8 : i32
    %2 = arith.muli %arg0, %c8_i32 : i32
    %3 = vector.extract_strided_slice %0 {offsets = [0, 0], sizes = [8, 8], strides = [1, 1]} : vector<8x200xf32> to vector<8x8xf32>
    %4 = vector.extract_strided_slice %3 {offsets = [0, 1], sizes = [8, 1], strides = [1, 1]} : vector<8x8xf32> to vector<8x1xf32>
    %cst = arith.constant 1.000000e-03 : f32
    %5 = vector.broadcast %cst : f32 to vector<8x1xf32>
    %6 = arith.cmpf olt, %4, %5 : vector<8x1xf32>
    %7 = vector.extract_strided_slice %3 {offsets = [0, 2], sizes = [8, 1], strides = [1, 1]} : vector<8x8xf32> to vector<8x1xf32>
    %cst_3 = arith.constant 1.000000e-03 : f32
    %8 = vector.broadcast %cst_3 : f32 to vector<8x1xf32>
    %9 = arith.cmpf olt, %7, %8 : vector<8x1xf32>
    %10 = vector.extract_strided_slice %3 {offsets = [0, 3], sizes = [8, 1], strides = [1, 1]} : vector<8x8xf32> to vector<8x1xf32>
    %cst_4 = arith.constant 1.000000e-03 : f32
    %11 = vector.broadcast %cst_4 : f32 to vector<8x1xf32>
    %12 = arith.cmpf olt, %10, %11 : vector<8x1xf32>
    %c3_i32 = arith.constant 3 : i32
    %c4_i32 = arith.constant 4 : i32
    %13 = vector.broadcast %c3_i32 : i32 to vector<8x1xi32>
    %14 = vector.broadcast %c4_i32 : i32 to vector<8x1xi32>
    %15 = arith.select %12, %13, %14 : vector<8x1xi1>, vector<8x1xi32>
    %c2_i32 = arith.constant 2 : i32
    %16 = vector.broadcast %c2_i32 : i32 to vector<8x1xi32>
    %17 = arith.select %9, %16, %15 : vector<8x1xi1>, vector<8x1xi32>
    %c1_i32 = arith.constant 1 : i32
    %18 = vector.broadcast %c1_i32 : i32 to vector<8x1xi32>
    %19 = arith.select %6, %18, %17 : vector<8x1xi1>, vector<8x1xi32>
    %20 = tpu.iota {dimensions = array<i32: 0>} : vector<8x1xi32>
    %21 = vector.broadcast %2 : i32 to vector<8x1xi32>
    %22 = arith.addi %21, %20 : vector<8x1xi32>
    %c20_i32 = arith.constant 20 : i32
    %23 = vector.broadcast %c20_i32 : i32 to vector<8x1xi32>
    %24 = arith.cmpi slt, %22, %23 : vector<8x1xi32>
    %c0_i32 = arith.constant 0 : i32
    %25 = vector.broadcast %c0_i32 : i32 to vector<8x1xi32>
    %26 = arith.cmpi eq, %20, %25 : vector<8x1xi32>
    %c0_i32_5 = arith.constant 0 : i32
    %27 = arith.cmpi eq, %arg0, %c0_i32_5 : i32
    %28 = vector.broadcast %27 : i1 to vector<8x1xi1>
    %29 = arith.andi %26, %28 : vector<8x1xi1>
    %30 = tpu.iota {dimensions = array<i32: 1>} : vector<8x8xi32>
    %31 = vector.extract_strided_slice %3 {offsets = [0, 0], sizes = [8, 1], strides = [1, 1]} : vector<8x8xf32> to vector<8x1xf32>
    %cst_6 = arith.constant 1.00000012 : f32
    %32 = vector.broadcast %cst_6 : f32 to vector<8x1xf32>
    %33 = arith.addf %31, %32 : vector<8x1xf32>
    %34 = arith.divf %31, %33 : vector<8x1xf32>
    %35 = math.log %34 : vector<8x1xf32>
    %36 = vector.broadcast %1 : f32 to vector<8x1xf32>
    %37 = arith.mulf %31, %36 : vector<8x1xf32>
    %38 = vector.broadcast %1 : f32 to vector<8x1xf32>
    %39 = arith.subf %38, %37 : vector<8x1xf32>
    %40 = vector.broadcast %39 : vector<8x1xf32> to vector<8x8xf32>
    %41 = arith.addf %40, %3 : vector<8x8xf32>
    %42 = tpu.reciprocal %41 {approx = true} : vector<8x8xf32> -> vector<8x8xf32>
    %43 = vector.broadcast %1 : f32 to vector<8x8xf32>
    %44 = arith.mulf %43, %42 : vector<8x8xf32>
    %45 = arith.mulf %3, %44 : vector<8x8xf32>
    %cst_7 = arith.constant 1.562510e-02 : f32
    %46 = vector.broadcast %cst_7 : f32 to vector<8x8xf32>
    %47 = arith.addf %45, %46 : vector<8x8xf32>
    %48 = arith.divf %45, %47 : vector<8x8xf32>
    %49 = math.log %48 : vector<8x8xf32>
    %c0_i32_8 = arith.constant 0 : i32
    %50 = vector.broadcast %c0_i32_8 : i32 to vector<8x8xi32>
    %51 = arith.cmpi eq, %30, %50 : vector<8x8xi32>
    %52 = vector.shape_cast %35 : vector<8x1xf32> to vector<8x1xf32>
    %53 = vector.broadcast %52 : vector<8x1xf32> to vector<8x8xf32>
    %54 = arith.select %51, %53, %49 : vector<8x8xi1>, vector<8x8xf32>
    %55 = vector.broadcast %19 : vector<8x1xi32> to vector<8x8xi32>
    %56 = arith.cmpi slt, %30, %55 : vector<8x8xi32>
    %57 = vector.broadcast %24 : vector<8x1xi1> to vector<8x8xi1>
    %58 = arith.andi %56, %57 : vector<8x8xi1>
    %cst_9 = arith.constant 0.000000e+00 : f32
    %59 = vector.broadcast %cst_9 : f32 to vector<8x8xf32>
    %60 = arith.select %58, %54, %59 : vector<8x8xi1>, vector<8x8xf32>
    %61 = vector.broadcast %19 : vector<8x1xi32> to vector<8x8xi32>
    %62 = arith.subi %61, %30 : vector<8x8xi32>
    %63 = arith.sitofp %62 : vector<8x8xi32> to vector<8x8xf32>
    %cst_10 = arith.constant 1.000000e+00 : f32
    %64 = vector.shape_cast %29 : vector<8x1xi1> to vector<8x1xi1>
    %65 = vector.broadcast %64 : vector<8x1xi1> to vector<8x8xi1>
    %66 = vector.broadcast %cst_10 : f32 to vector<8x8xf32>
    %67 = arith.select %65, %66, %63 : vector<8x8xi1>, vector<8x8xf32>
    %68 = arith.mulf %60, %67 : vector<8x8xf32>
    %69 = vector.shape_cast %68 : vector<8x8xf32> to vector<1x8x8xf32>
    %cst_11 = arith.constant dense<0.000000e+00> : vector<1xf32>
    %70 = vector.multi_reduction <add>, %69, %cst_11 [1, 2] : vector<1x8x8xf32> to vector<1xf32>
    %71 = vector.shape_cast %70 : vector<1xf32> to vector<1x1x1xf32>
    %72 = vector.extract %71[0, 0, 0] : f32 from vector<1x1x1xf32>
    %cst_12 = arith.constant 1.00000012 : f32
    %73 = vector.broadcast %cst_12 : f32 to vector<8x200xf32>
    %74 = arith.addf %0, %73 : vector<8x200xf32>
    %75 = math.log %74 : vector<8x200xf32>
    %cst_13 = arith.constant dense<0.000000e+00> : vector<8xf32>
    %76 = vector.multi_reduction <add>, %75, %cst_13 [1] : vector<8x200xf32> to vector<8xf32>
    %77 = vector.shape_cast %76 : vector<8xf32> to vector<8x1xf32>
    %78 = vector.broadcast %19 : vector<8x1xi32> to vector<8x8xi32>
    %79 = arith.cmpi slt, %30, %78 : vector<8x8xi32>
    %cst_14 = arith.constant 1.00000012 : f32
    %80 = vector.broadcast %cst_14 : f32 to vector<8x8xf32>
    %81 = arith.addf %3, %80 : vector<8x8xf32>
    %82 = math.log %81 : vector<8x8xf32>
    %cst_15 = arith.constant 0.000000e+00 : f32
    %83 = vector.broadcast %cst_15 : f32 to vector<8x8xf32>
    %84 = arith.select %79, %82, %83 : vector<8x8xi1>, vector<8x8xf32>
    %cst_16 = arith.constant dense<0.000000e+00> : vector<8xf32>
    %85 = vector.multi_reduction <add>, %84, %cst_16 [1] : vector<8x8xf32> to vector<8xf32>
    %86 = vector.shape_cast %85 : vector<8xf32> to vector<8x1xf32>
    %87 = arith.subf %77, %86 : vector<8x1xf32>
    %cst_17 = arith.constant 0.000000e+00 : f32
    %88 = vector.broadcast %cst_17 : f32 to vector<8x1xf32>
    %89 = arith.select %24, %87, %88 : vector<8x1xi1>, vector<8x1xf32>
    %c200_i32 = arith.constant 200 : i32
    %90 = vector.broadcast %c200_i32 : i32 to vector<8x1xi32>
    %91 = arith.subi %90, %19 : vector<8x1xi32>
    %92 = arith.sitofp %91 : vector<8x1xi32> to vector<8x1xf32>
    %cst_18 = arith.constant 0.000000e+00 : f32
    %93 = vector.broadcast %cst_18 : f32 to vector<8x1xf32>
    %94 = arith.select %24, %92, %93 : vector<8x1xi1>, vector<8x1xf32>
    %95 = vector.shape_cast %94 : vector<8x1xf32> to vector<1x8x1xf32>
    %cst_19 = arith.constant dense<0.000000e+00> : vector<1xf32>
    %96 = vector.multi_reduction <add>, %95, %cst_19 [1, 2] : vector<1x8x1xf32> to vector<1xf32>
    %97 = vector.shape_cast %96 : vector<1xf32> to vector<1x1x1xf32>
    %98 = vector.extract %97[0, 0, 0] : f32 from vector<1x1x1xf32>
    %cst_20 = arith.constant 0.000000e+00 : f32
    %99 = arith.mulf %cst_20, %98 : f32
    %100 = vector.shape_cast %89 : vector<8x1xf32> to vector<1x8x1xf32>
    %cst_21 = arith.constant dense<0.000000e+00> : vector<1xf32>
    %101 = vector.multi_reduction <add>, %100, %cst_21 [1, 2] : vector<1x8x1xf32> to vector<1xf32>
    %102 = vector.shape_cast %101 : vector<1xf32> to vector<1x1x1xf32>
    %103 = vector.extract %102[0, 0, 0] : f32 from vector<1x1x1xf32>
    %104 = arith.subf %99, %103 : f32
    %105 = arith.addf %72, %104 : f32
    %106 = vector.broadcast %105 : f32 to vector<1x8x128xf32>
    %c0_22 = arith.constant 0 : index
    %c0_23 = arith.constant 0 : index
    %c0_24 = arith.constant 0 : index
    %107 = vector.load %arg3[%c0_22, %c0_23, %c0_24] : memref<1x8x128xf32, #tpu.memory_space<vmem>>, vector<1x8x128xf32>
    tpu.vector_store %arg3[%c0_22, %c0_23, %c0_24], %106 {strides = array<i32>} : memref<1x8x128xf32, #tpu.memory_space<vmem>>, vector<1x8x128xf32>,
    return
  }
  func.func @transform_0(%arg0: i32) -> (i32, i32) {
    %c0_i32 = arith.constant 0 : i32
    %c0_i32_0 = arith.constant 0 : i32
    %c0_i32_1 = arith.constant 0 : i32
    return %c0_i32, %c0_i32_0 : i32, i32
  }
  func.func @transform_1(%arg0: i32) -> (i32, i32) {
    %c0_i32 = arith.constant 0 : i32
    %c0_i32_0 = arith.constant 0 : i32
    return %arg0, %c0_i32 : i32, i32
  }
  func.func @transform_2(%arg0: i32) -> (i32, i32, i32) {
    %c0_i32 = arith.constant 0 : i32
    %c0_i32_0 = arith.constant 0 : i32
    %c0_i32_1 = arith.constant 0 : i32
    return %arg0, %c0_i32, %c0_i32_0 : i32, i32, i32
  }
}

</mosaic_0001>

<bundles_post_ra>
// kernel: tpu_custom_call.1
= control target key start
LH: loop header
LB: loop body
LE: loop exit
PB: predicated region body
PF: predicated region fallthrough
CT: control target
= control target key end

     0   :  { %s755_s0 = inlined_call_operand.<no memory space> [shape: f32[1,1], index: 0, kind: input, shape index: {}]   ;;  %s756_s1 = inlined_call_operand.hbm [shape: f32[20,200], index: 1, kind: input, shape index: {}]   ;;  %s757_s2 = inlined_call_operand.hbm [shape: f32[3,8,128], index: 2, kind: output, shape index: {}]  }
   0x1   :  { %7 = sst [smem:[#allocation2]] %s755_s0 }
   0x2   :  { %8 = vsyncpa [#allocation4], 0 }
   0x3   :  { %10 = vsyncpa [#allocation4 + $0x1], 0 }
   0x4   :  { %11 = vsyncpa [#allocation5], 0 }
   0x5   :  { %13 = vsyncpa [#allocation5 + $0x1], 0  ;;  %s580_s11 = smov 0   ;;  %s582_s12 = smov 0  }
   0x6   :  { %s584_s13 = smov 0   ;;  %s586_s14 = smov 0  }
   0x7 LB: > { %s601_s0 = sadd.s32 4294967295, %s554_s14   ;;  %s373_s15 = sadd.s32 4294967294, %s554_s14   ;;  %s554_s14 = sphi %s586_s14, %s775_s14   ;;  %s550_s13 = sphi %s584_s13, %s774_s13   ;;  %s546_s12 = sphi %s582_s12, %s773_s12   ;;  %s542_s11 = sphi %s580_s11, %s772_s11  }
   0x8   : > { %s605_s16 = sadd.s32 1, %s554_s14   ;;  %s47_s17 = sadd.s32 1, %s550_s13 }
   0x9   : > { %s44_s18 = ssub.s32 %s554_s14, %s605_s16  ;;  %p54_p0 = scmp.ne.s32.totalorder %s550_s13, %s546_s12 }
   0xa   : > { %p45_p1 = scmp.eq.s32.totalorder %s44_s18, 0  ;;  %p55_p2 = scmp.eq.s32.totalorder %s554_s14, 0 }
   0xb   : > { %p60_p3 = scmp.ne.s32.totalorder %s546_s12, %s542_s11  ;;  %p758_p4 = scmp.eq.s32.totalorder %s601_s0, 0 }
   0xc   : > { %s617_s19 = scalar_select %p45_p1, %s550_s13, %s47_s17  }
   0xd   : > { %p619_p5 = por %p55_p2, %p54_p0  ;;  %p625_p6 = por %p758_p4, %p60_p3 }
   0xe   : > { %p84_p7 = scmp.eq.s32.totalorder %s601_s0, 2  ;;  %p90_p8 = scmp.eq.s32.totalorder %s373_s15, 2 }
   0xf   : > { %s762_s21 = scalar_select %p625_p6, 1, 0 }
  0x10   : > { %p406_p9 = scmp.lt.s32.totalorder %s554_s14, 3  ;;  %p631_p10 = por %p84_p7, %p54_p0 }
  0x11   : > { %p635_p11 = por %p90_p8, %p60_p3  ;;  %s113_s24 = sand.u32 1, %s550_s13  }
  0x12   : > { %s763_s22 = scalar_select %p631_p10, 1, 0 }
  0x13   : > { %s764_s23 = scalar_select %p635_p11, 1, 0 }
  0x14   : > { %s387_s25 = sshll.u32 %s554_s14, 8  ;;  %s376_s26 = sshll.u32 %s113_s24, 4 }
  0x15   : > { %s644_s29 = scalar_lea.hbm %s756_s1, %s387_s25  ;;  %s117_s30 = scalar_lea.vmem [#allocation3], %s376_s26 }
  0x16   : > { %s125_s3 = sshll.u32 %s117_s30, 4  ;;  %p648_p12 = pnand %p406_p9, %p619_p5  ;;  %s652_s3 = int_to_ptr.vmem [resolvable:$true] %s125_s3 }
  0x17   : > { %s114_s5 = scalar_lea.sflag [#allocation4], %s113_s24  ;;  %s462_s6 = scalar_lea.hbm %s644_s29, 256 }
  0x18   : > { %p463_p1 = scmp.ne.s32.totalorder %s644_s29, %s462_s6  ;;  %p464_p2 = pneg %p648_p12 }
  0x19   : > { %s467_s9 = scalar_lea.hbm %s756_s1, 768  ;;  %p468_p5 = scmp.lt.s32.totalorder %s644_s29, %s756_s1 }
  0x1a   : > { %p465_p3 = pnand %p464_p2, %p463_p1  ;;  %p469_p8 = scmp.lt.s32.totalorder %s467_s9, %s462_s6 }
  0x1c   : > { %p466_p7 = pneg %p465_p3  ;;  %p470_p9 = por %p469_p8, %p468_p5 }
  0x1e   : > { %p471_p4 = pnand %p470_p9, %p466_p7 }
  0x20   : > { %474 = shalt.err (!%p471_p4)
}
  0x21   : > { %s475_s17 = scalar_lea.vmem %s652_s3, 256  ;;  %s556_s18 = smov [#allocation3]  }
  0x22   : > { %p476_p13 = scmp.ne.s32.totalorder %s652_s3, %s475_s17  ;;  %s480_s20 = sshll.u32 %s556_s18, 4  ;;  %s481_s20 = int_to_ptr.vmem [resolvable:$false] %s480_s20 }
  0x23   : > { %s482_s24 = scalar_lea.vmem %s481_s20, 512  ;;  %p483_p3 = scmp.lt.s32.totalorder %s652_s3, %s481_s20 }
  0x24   : > { %p478_p0 = pnand %p476_p13, %p464_p2  ;;  %p484_p11 = scmp.lt.s32.totalorder %s482_s24, %s475_s17 }
  0x26   : > { %p479_p1 = pneg %p478_p0  ;;  %p485_p10 = por %p484_p11, %p483_p3 }
  0x28   : > { %p486_p6 = pnand %p485_p10, %p479_p1 }
  0x2a   : > { %489 = shalt.err (!%p486_p6)
}
  0x2b   : > { %401 = dma.hbm_to_vmem [thread:$0]  (!%p648_p12), %s644_s29, 256, %s652_s3, %s114_s5  }
  0x2c   : > { %p766_p4 = scmp.lt.s32.totalorder %s554_s14, 4  ;;  %p767_p7 = scmp.ge.s32.totalorder %s554_s14, 1 }
  0x2e   : > { %p131_p13 = pnand %p767_p7, %p766_p4 }
  0x2f   : > { %s679_s25 = sand.u32 (!%p131_p13), 1, %s546_s12   ;;  %p768_p6 = scmp.ne.s32.totalorder (!%p131_p13), %s762_s21, 0 }
  0x30   : > { %134 = sbr.rel (%p131_p13) target bundleno = 779 (0x30b), region = 28  ;;  %s380_s26 = sshll.u32 (!%p131_p13), %s679_s25, 4 }
  0x31   : > { %s137_s27 = scalar_lea.sflag (!%p131_p13), [#allocation4], %s679_s25  ;;  %s140_s28 = scalar_lea.vmem (!%p131_p13), [#allocation3], %s380_s26 }
  0x35   : > { %533 = dma.done.wait (%p768_p6), %s137_s27, 256  }
  0x36   : > { %535 = vsyncadd (%p768_p6), %s137_s27, 4294967040  ;;  %v687_v0 = vld [vmem:[%s140_s28] sm:$0xff]  ;;  %v557_v1 = vmov 4   ;;  %s558_s29 = smov 127   ;;  %v559_v3 = vmov 1   ;;  %v560_v4 = vmov 0   ;;  %v173_v25 = vlaneseq }
  0x37   : > { %vm165_vm0 = vcmp.lt.f32.partialorder %v687_v0, 0.001  ;;  %444 = vset.pattern.permute.xlu1 %v559_v3  ;;  %446 = vset.pattern.permute.xlu0 %v560_v4  ;;  %v162_v5 = vld [vmem:[%s140_s28 + $0x8] sm:$0xff]  ;;  %v186_v9 = vadd.f32 1.0000001, %v687_v0  ;;  %vm245_vm1 = vcmask 588800  }
  0x38   : > { %v166_v2 = vsel %vm165_vm0, 3, %v557_v1  ;;  %v240_v8 = vadd.f32 1.0000001, %v162_v5  ;;  %s163_s21 = sld [smem:[#allocation2]]  ;;  %v185_v26 = vand.u32 127, %v173_v25  ;;  %vm229_vm2 = vcmask 64512  }
  0x39   : > { %167 = vrot.lane.b32.xlu0 %v166_v2, %s558_s29  ;;  %s382_s30 = sshll.u32 %s601_s0, 3  ;;  %v174_v32 = vshrl.u32 %v173_v25, 7  ;;  %p769_p10 = scmp.eq.s32.totalorder %s601_s0, 0  ;;  %vm263_vm10 = vcmask 7168  }
  0x3a   : > { %448 = vlog2.f32 %v240_v8  ;;  %v175_v33 = vstv %s382_s30  ;;  %vm208_vm7 = vcmp.eq.s32.totalorder %v185_v26, 0  ;;  %s381_s4 = sshll.u32 %s679_s25, 3  ;;  %s384_s9 = sshll.u32 %s601_s0, 7 }
  0x3b   : > { %450 = vlog2.f32 %v186_v9  ;;  %v176_v35 = vadd.s32 %v175_v33, %v174_v32  ;;  %s180_s3 = scalar_select %p769_p10, 1, 0  ;;  %vm178_vm5 = vcmp.eq.s32.totalorder %v174_v32, 0 }
  0x3c   : > { %452 = vrcp.f32 %v186_v9  ;;  %s160_s15 = scalar_lea.vmem [#allocation6], %s381_s4  ;;  %s719_s26 = scalar_lea.hbm %s757_s2, %s384_s9 }
  0x3d   : > { %vm177_vm4 = vcmp.lt.s32.totalorder %v176_v35, 20  ;;  %v181_v45 = vstv %s180_s3  ;;  %s303_s17 = sshll.u32 %s160_s15, 4  ;;  %s290_s27 = scalar_lea.sflag [#allocation5], %s679_s25  ;;  %s304_s17 = int_to_ptr.vmem [resolvable:$true] %s303_s17 }
  0x3e   : > { %v191_v20 = vstv %s163_s21  ;;  %vm182_vm6 = vcmp.eq.s32.totalorder %v181_v45, 1  ;;  %s490_s28 = scalar_lea.vmem %s304_s17, 128  ;;  %p770_p12 = scmp.ne.s32.totalorder %s763_s22, 0 }
  0x3f   : > { %v192_v21 = vmul.f32 %v191_v20, %v687_v0  ;;  %vm183_vm8 = vmand %vm178_vm5, %vm182_vm6  ;;  %p491_p11 = scmp.ne.s32.totalorder %s304_s17, %s490_s28 }
  0x41   : > { %v193_v24 = vsub.f32 %v191_v20, %v192_v21  ;;  %p492_p0 = pnand %p491_p11, %p770_p12 }
  0x43   : > { %p493_p2 = pneg %p492_p0 }
  0x47   : > { %v449_v10 = vpop.eup %448 }
  0x48   : > { %v451_v11 = vpop.eup %450  ;;  %v244_v12 = vmul.f32 0.6931472, %v449_v10 }
  0x49   : > { %v242_v13 = vmul.f32 0.6931472, %v451_v11  ;;  %v453_v15 = vpop.eup %452 }
  0x4a   : > { %v246_v14 = vsel %vm245_vm1, %v244_v12, 0.0  ;;  %v188_v17 = vmul.f32 %v453_v15, %v687_v0 }
  0x4b   : > { %v247_v16 = vadd.f32 %v246_v14, %v242_v13 }
  0x4c   : > { %454 = vlog2.f32 %v188_v17 }
  0x59   : > { %v455_v18 = vpop.eup %454 }
  0x5a   : > { %v190_v19 = vmul.f32 0.6931472, %v455_v18 }
  0xab   : > { %v168_v6 = vpop.permute.xlu0 %167 }
  0xac   : > { %v169_v7 = vsel %vm165_vm0, 2, %v168_v6 }
  0xad   : > { %170 = vrot.lane.b32.xlu0 %v169_v7, %s558_s29 }
  0xcc   : > { %248 = vadd.xlane.f32.xlu0 %v247_v16 }
  0xe2   : > { %211 = vperm.xlu0 %446, %v190_v19  }
  0xe6   : > { %447 = vset.pattern.permute.xlu0 %v559_v3 }
 0x11f   : > { %v171_v22 = vpop.permute.xlu0 %170 }
 0x120   : > { %v172_v23 = vsel %vm165_vm0, 1, %v171_v22 }
 0x121   : > { %216 = vperm.xlu1 %444, %v172_v23   ;;  %v256_v34 = vsub.s32 200, %v172_v23 }
 0x123   : > { %v257_v36 = vcvt.s32.f32 %v256_v34 }
 0x125   : > { %445 = vset.pattern.permute.xlu1 %v560_v4  ;;  %v258_v37 = vsel %vm177_vm4, %v257_v36, 0.0 }
 0x126   : > { %196 = vperm.xlu1 %445, %v193_v24  }
 0x155   : > { %v249_v44 = vpop.xlane.xlu0 %248 }
 0x15d   : > { %v212_v49 = vpop.permute.xlu0 %211 }
 0x19c   : > { %v217_v27 = vpop.permute.xlu1 %216 }
 0x19d   : > { %vm218_vm3 = vcmp.lt.s32.totalorder %v185_v26, %v217_v27  ;;  %v223_v46 = vsub.s32 %v217_v27, %v185_v26 }
 0x19e   : > { %v250_v28 = vsel %vm218_vm3, %v242_v13, 0.0  ;;  %vm221_vm9 = vmand %vm218_vm3, %vm177_vm4 }
 0x19f   : > { %v251_v29 = vsel %vm229_vm2, %v250_v28, 0.0  ;;  %v224_v48 = vcvt.s32.f32 %v223_v46 }
 0x1a0   : > { %252 = vadd.xlane.f32.xlu1 %v251_v29 }
 0x1a1   : > { %v197_v30 = vpop.permute.xlu1 %196  ;;  %v227_v53 = vsel %vm183_vm8, 1.0, %v224_v48 }
 0x1a2   : > { %v199_v31 = vadd.f32 %v197_v30, %v687_v0 }
 0x1a4   : > { %456 = vrcp.f32 %v199_v31 }
 0x1b1   : > { %v457_v38 = vpop.eup %456  ;;  %260 = vrot.lane.b32.xlu1 %v258_v37, %s558_s29  ;;  %s561_s29 = smov [#allocation6]  }
 0x1b2   : > { %v201_v39 = vmul.f32 %v457_v38, %v191_v20  ;;  %s494_s0 = sshll.u32 %s561_s29, 4  ;;  %s495_s0 = int_to_ptr.vmem [resolvable:$false] %s494_s0 }
 0x1b3   : > { %s496_s21 = scalar_lea.vmem %s495_s0, 256  ;;  %p497_p5 = scmp.lt.s32.totalorder %s304_s17, %s495_s0 }
 0x1b4   : > { %v202_v40 = vmul.f32 %v201_v39, %v687_v0  ;;  %p498_p8 = scmp.lt.s32.totalorder %s496_s21, %s490_s28 }
 0x1b6   : > { %v203_v41 = vadd.f32 0.0156251, %v202_v40  ;;  %p499_p9 = por %p498_p8, %p497_p5 }
 0x1b8   : > { %458 = vrcp.f32 %v203_v41  ;;  %p500_p1 = pnand %p499_p9, %p493_p2 }
 0x1c5   : > { %v459_v42 = vpop.eup %458 }
 0x1c6   : > { %v205_v43 = vmul.f32 %v459_v42, %v202_v40 }
 0x1c8   : > { %460 = vlog2.f32 %v205_v43 }
 0x1d5   : > { %v461_v47 = vpop.eup %460 }
 0x1d6   : > { %v207_v50 = vmul.f32 0.6931472, %v461_v47 }
 0x1d8   : > { %v214_v51 = vsel %vm208_vm7, %v212_v49, %v207_v50 }
 0x1d9   : > { %v222_v52 = vsel %vm221_vm9, %v214_v51, 0.0 }
 0x1da   : > { %v228_v54 = vmul.f32 %v227_v53, %v222_v52 }
 0x1dc   : > { %v230_v55 = vsel %vm229_vm2, %v228_v54, 0.0 }
 0x1dd   : > { %231 = vadd.xlane.f32.xlu1 %v230_v55 }
 0x229   : > { %v253_v56 = vpop.xlane.xlu1 %252 }
 0x22a   : > { %v254_v57 = vsub.f32 %v249_v44, %v253_v56 }
 0x22c   : > { %v255_v58 = vsel %vm177_vm4, %v254_v57, 0.0 }
 0x22d   : > { %v261_v59 = vpop.permute.xlu1 %260  ;;  %v275_v60 = vsel %vm263_vm10, %v255_v58, 0.0 }
 0x22e   : > { %276 = vadd.xlane.f32.xlu1 %v275_v60  ;;  %v264_v61 = vsel %vm263_vm10, %v261_v59, 0.0 }
 0x22f   : > { %265 = vadd.xlane.f32.xlu0 %v264_v61 }
 0x266   : > { %v232_v62 = vpop.xlane.xlu1 %231 }
 0x267   : > { %v233_v63 = vrot.slane %v232_v62, 4 }
 0x269   : > { %v234_v0 = vadd.f32 %v233_v63, %v232_v62 }
 0x26b   : > { %v235_v1 = vrot.slane %v234_v0, 2 }
 0x26d   : > { %v236_v2 = vadd.f32 %v235_v1, %v234_v0 }
 0x26f   : > { %v237_v3 = vrot.slane %v236_v2, 1 }
 0x271   : > { %v238_v4 = vadd.f32 %v237_v3, %v236_v2 }
 0x273   : > { %388 = vpush %v238_v4 }
 0x2a4   : > { %s389_s5 = spop %388 }
 0x2b7   : > { %v277_v5 = vpop.xlane.xlu1 %276 }
 0x2b8   : > { %v278_v6 = vrot.slane %v277_v5, 4  ;;  %v266_v7 = vpop.xlane.xlu0 %265 }
 0x2b9   : > { %v267_v8 = vrot.slane %v266_v7, 4 }
 0x2ba   : > { %v279_v9 = vadd.f32 %v278_v6, %v277_v5 }
 0x2bb   : > { %v268_v10 = vadd.f32 %v267_v8, %v266_v7 }
 0x2bc   : > { %v280_v11 = vrot.slane %v279_v9, 2 }
 0x2bd   : > { %v269_v12 = vrot.slane %v268_v10, 2 }
 0x2be   : > { %v281_v13 = vadd.f32 %v280_v11, %v279_v9 }
 0x2bf   : > { %v270_v14 = vadd.f32 %v269_v12, %v268_v10 }
 0x2c0   : > { %v282_v15 = vrot.slane %v281_v13, 1 }
 0x2c1   : > { %v271_v16 = vrot.slane %v270_v14, 1 }
 0x2c2   : > { %v283_v17 = vadd.f32 %v282_v15, %v281_v13 }
 0x2c3   : > { %v272_v18 = vadd.f32 %v271_v16, %v270_v14 }
 0x2c5   : > { %390 = vpush %v272_v18 }
 0x2c6   : > { %392 = vpush %v283_v17 }
 0x2f6   : > { %s391_s6 = spop %390 }
 0x2f7   : > { %s274_s7 = smul.f32 0.0, %s391_s6  ;;  %s393_s8 = spop %392 }
 0x2f9   : > { %s285_s10 = ssub.f32 %s274_s7, %s393_s8 }
 0x2fb   : > { %s286_s18 = sadd.f32 %s389_s5, %s285_s10 }
 0x2fd   : > { %v287_v19 = vstv %s286_s18 }
 0x2fe   : > { %288 = vst [vmem:[%s160_s15] sm:$0xff] %v287_v19 }
 0x2ff   : > { %503 = shalt.err (!%p500_p1)
}
 0x300   : > { %s504_s30 = scalar_lea.hbm %s719_s26, 128  ;;  %s508_s4 = scalar_lea.hbm %s757_s2, 384 }
 0x301   : > { %p505_p3 = scmp.ne.s32.totalorder %s719_s26, %s504_s30  ;;  %p509_p13 = scmp.lt.s32.totalorder %s719_s26, %s757_s2 }
 0x302   : > { %p510_p6 = scmp.lt.s32.totalorder %s508_s4, %s504_s30 }
 0x303   : > { %p506_p4 = pnand %p505_p3, %p770_p12 }
 0x304   : > { %p511_p10 = por %p510_p6, %p509_p13 }
 0x305   : > { %p507_p7 = pneg %p506_p4 }
 0x307   : > { %p512_p11 = pnand %p511_p10, %p507_p7 }
 0x309   : > { %515 = shalt.err (!%p512_p11)
}
 0x30a   : > { %396 = dma.vmem_to_hbm [thread:$0]  (%p770_p12), %s304_s17, 128, %s719_s26, %s290_s27  }
 0x30b PF: > { %p407_p0 = scmp.ge.s32.totalorder %s554_s14, 2  ;;  %s315_s7 = sand.u32 1, %s542_s11  }
 0x30c   : > { %p771_p2 = scmp.ne.s32.totalorder %s764_s23, 0  ;;  %s316_s8 = scalar_lea.sflag [#allocation5], %s315_s7 }
 0x30e   : > { %p403_p5 = pnand %p407_p0, %p771_p2 }
 0x310   : > { %p404_p8 = pneg %p403_p5 }
 0x312   : > { %537 = dma.done.wait (%p404_p8), %s316_s8, 128  }
 0x313   : > { %539 = vsyncadd (%p404_p8), %s316_s8, 4294967168  ;;  %p16_p9 = scmp.ge.s32.totalorder %s605_s16, 5   ;;  %s772_s11 = smov %s546_s12 }
 0x314   : > { %s773_s12 = smov %s550_s13  ;;  %s774_s13 = smov %s617_s19 }
 0x315   : > { %s775_s14 = smov %s605_s16  ;;  %18 = sbr.rel (!%p16_p9) target bundleno = 7 (0x7), region = 73 }
 0x31a   :  { %321 = vsyncpa [#allocation4], 1 }
 0x31b   :  { %323 = vsyncpa [#allocation4 + $0x1], 1 }
 0x31c   :  { %324 = vsyncpa [#allocation5], 1 }
 0x31d   :  { %326 = vsyncpa [#allocation5 + $0x1], 1 }

</bundles_post_ra>
